<compile_context>
chip_gen: v6e
topology: v6e:2x2x1
jax: 0.10.0
libtpu: 0.0.40
codegen_flags: <defaults>
</compile_context>

<pallas_src>
import functools
import math

import jax
import jax.numpy as jnp
from jax.experimental import pallas as pl
from jax.experimental.pallas import tpu as pltpu


def _fc_kernel(x_ref, w_ref, b_ref, o_ref, *, inv_hw):
    # x_ref : (TB, HW, C)   activation tile, lanes = channels (lane-dense)
    # w_ref : (C, O_pad)    linear weight, pre-transposed, resident
    # b_ref : (1, O_pad)    linear bias, resident
    # o_ref : (TB, O_pad)
    # AdaptiveAvgPool2d(1) == mean over spatial positions; accumulate in f32
    # without materializing the whole tile in f32.
    pooled = jnp.sum(x_ref[...], axis=1, dtype=jnp.float32) * inv_hw      # (TB, C)
    # MXU consumes the weight in its native dtype; accumulate in f32.
    out = jnp.dot(pooled.astype(w_ref.dtype), w_ref[...],
                  preferred_element_type=jnp.float32)                     # (TB, O_pad)
    out = out + b_ref[...].astype(jnp.float32)
    o_ref[...] = out.astype(o_ref.dtype)


def _round_up(n, m):
    return ((n + m - 1) // m) * m


def _pick_batch_tile(B, C, HW, itemsize, budget_bytes=4 * 1024 * 1024):
    """Largest multiple-of-8 batch tile whose x slab stays under budget.

    Double-buffered (2x) this stays well inside the 16 MiB v5e scoped-VMEM
    default, and far under v6e/v7x budgets.
    """
    per_row = max(C * HW * itemsize, 1)
    tb = (budget_bytes // per_row) // 8 * 8
    tb = max(8, tb)
    tb = min(tb, _round_up(B, 8))
    return max(8, tb)


def fc_forward(x, weight, bias):
    """x: (B, C, H, W); weight: (outplane, inplane); bias: (outplane,)."""
    B, C, H, W = x.shape
    outplane, inplane = weight.shape
    assert inplane == C, "Linear in_features must equal channel count"
    HW = H * W

    # Layout plumbing in plain JAX: lane-dense (B, HW, C).
    x_l = jnp.transpose(x, (0, 2, 3, 1)).reshape(B, HW, C)

    # Pad output features to a lane multiple (unmasked stores); slice later.
    O_pad = _round_up(outplane, 128)
    w_t = jnp.zeros((C, O_pad), weight.dtype).at[:, :outplane].set(weight.T)
    b2d = jnp.zeros((1, O_pad), bias.dtype).at[:, :outplane].set(bias)

    # Batch tiling for the auto-pipelined HBM->VMEM stream.
    TB = _pick_batch_tile(B, C, HW, jnp.dtype(x.dtype).itemsize)
    B_pad = _round_up(B, TB)
    if B_pad != B:
        x_l = jnp.pad(x_l, ((0, B_pad - B), (0, 0), (0, 0)))

    grid = (B_pad // TB,)
    kernel = functools.partial(_fc_kernel, inv_hw=1.0 / float(HW))

    out_padded = pl.pallas_call(
        kernel,
        out_shape=jax.ShapeDtypeStruct((B_pad, O_pad), x.dtype),
        grid_spec=pltpu.PrefetchScalarGridSpec(
            num_scalar_prefetch=0,
            grid=grid,
            in_specs=[
                pl.BlockSpec((TB, HW, C), lambda i: (i, 0, 0)),   # streamed tile
                pl.BlockSpec((C, O_pad), lambda i: (0, 0)),       # resident weight
                pl.BlockSpec((1, O_pad), lambda i: (0, 0)),       # resident bias
            ],
            out_specs=pl.BlockSpec((TB, O_pad), lambda i: (i, 0)),
        ),
        compiler_params=pltpu.CompilerParams(
            dimension_semantics=("parallel",),   # shards batch tiles on v7x's 2 TCs
        ),
    )(x_l, w_t, b2d)

    return out_padded[:B, :outplane]


def init_fc_params(key, inplane, outplane, dtype=jnp.float32):
    """Deterministic init mimicking nn.Linear default (uniform +-1/sqrt(in))."""
    kw, kb = jax.random.split(key)
    bound = 1.0 / math.sqrt(inplane)
    weight = jax.random.uniform(kw, (outplane, inplane), dtype,
                                minval=-bound, maxval=bound)
    bias = jax.random.uniform(kb, (outplane,), dtype,
                              minval=-bound, maxval=bound)
    return weight, bias


if __name__ == "__main__":
    key = jax.random.PRNGKey(0)
    kx, kp = jax.random.split(key)

    B, C, H, W = 2, 32, 8, 8       # inplane = C = 32
    outplane = 64

    x = jax.random.normal(kx, (B, C, H, W), dtype=jnp.float32)
    weight, bias = init_fc_params(kp, inplane=C, outplane=outplane)

    out = fc_forward(x, weight, bias)
    out = jax.block_until_ready(out)

    # Reference check in plain JAX (same semantics as the PyTorch module).
    ref = jnp.mean(x, axis=(2, 3)) @ weight.T + bias
    assert out.shape == (B, outplane)
    assert jnp.allclose(out, ref, atol=1e-4, rtol=1e-4)

    print("KERNEL_OK")
</pallas_src>

<mosaic_0001>
module attributes {stable_mosaic.version = 11 : i64} {
  func.func @_fc_kernel(%arg0: i32, %arg1: memref<8x64x32xf32, #tpu.memory_space<vmem>>, %arg2: memref<32x128xf32, #tpu.memory_space<vmem>>, %arg3: memref<1x128xf32, #tpu.memory_space<vmem>>, %arg4: memref<8x128xf32, #tpu.memory_space<vmem>>) attributes {dimension_semantics = [#tpu.dimension_semantics<parallel>], iteration_bounds = array<i64: 1>, scalar_prefetch = 0 : i64, scratch_operands = 0 : i64, tpu.core_type = #tpu.core_type<tc>, window_params = [{transform_indices = @transform_0, window_bounds = array<i64: 8, 64, 32>}, {pipeline_mode = #tpu.pipeline_mode<synchronous>, transform_indices = @transform_1, window_bounds = array<i64: 32, 128>}, {pipeline_mode = #tpu.pipeline_mode<synchronous>, transform_indices = @transform_2, window_bounds = array<i64: 1, 128>}, {transform_indices = @transform_3, window_bounds = array<i64: 8, 128>}]} {
    %c0 = arith.constant 0 : index
    %c0_0 = arith.constant 0 : index
    %c0_1 = arith.constant 0 : index
    %0 = vector.load %arg1[%c0, %c0_0, %c0_1] : memref<8x64x32xf32, #tpu.memory_space<vmem>>, vector<8x64x32xf32>
    %cst = arith.constant dense<0.000000e+00> : vector<8x32xf32>
    %1 = vector.multi_reduction <add>, %0, %cst [1] : vector<8x64x32xf32> to vector<8x32xf32>
    %cst_2 = arith.constant 1.562500e-02 : f32
    %2 = vector.broadcast %cst_2 : f32 to vector<8x32xf32>
    %3 = arith.mulf %1, %2 : vector<8x32xf32>
    %c0_3 = arith.constant 0 : index
    %c0_4 = arith.constant 0 : index
    %4 = vector.load %arg2[%c0_3, %c0_4] : memref<32x128xf32, #tpu.memory_space<vmem>>, vector<32x128xf32>
    %cst_5 = arith.constant dense<0.000000e+00> : vector<8x128xf32>
    %5 = tpu.matmul %3, %4, %cst_5 {dimension_numbers = #tpu.dot_dimension_numbers<[1], [0], [0], [1], [0, 0, 1, 1], [], []>} : vector<8x32xf32>, vector<32x128xf32>, vector<8x128xf32> -> vector<8x128xf32>
    %c0_6 = arith.constant 0 : index
    %c0_7 = arith.constant 0 : index
    %6 = vector.load %arg3[%c0_6, %c0_7] : memref<1x128xf32, #tpu.memory_space<vmem>>, vector<1x128xf32>
    %7 = vector.broadcast %6 : vector<1x128xf32> to vector<8x128xf32>
    %8 = arith.addf %5, %7 : vector<8x128xf32>
    %c0_8 = arith.constant 0 : index
    %c0_9 = arith.constant 0 : index
    %9 = vector.load %arg4[%c0_8, %c0_9] : memref<8x128xf32, #tpu.memory_space<vmem>>, vector<8x128xf32>
    tpu.vector_store %arg4[%c0_8, %c0_9], %8 {strides = array<i32>} : memref<8x128xf32, #tpu.memory_space<vmem>>, vector<8x128xf32>,
    return
  }
  func.func @transform_0(%arg0: i32) -> (i32, i32, i32) {
    %c0_i32 = arith.constant 0 : i32
    %c0_i32_0 = arith.constant 0 : i32
    %c0_i32_1 = arith.constant 0 : i32
    return %arg0, %c0_i32, %c0_i32_0 : i32, i32, i32
  }
  func.func @transform_1(%arg0: i32) -> (i32, i32) {
    %c0_i32 = arith.constant 0 : i32
    %c0_i32_0 = arith.constant 0 : i32
    %c0_i32_1 = arith.constant 0 : i32
    return %c0_i32, %c0_i32_0 : i32, i32
  }
  func.func @transform_2(%arg0: i32) -> (i32, i32) {
    %c0_i32 = arith.constant 0 : i32
    %c0_i32_0 = arith.constant 0 : i32
    %c0_i32_1 = arith.constant 0 : i32
    return %c0_i32, %c0_i32_0 : i32, i32
  }
  func.func @transform_3(%arg0: i32) -> (i32, i32) {
    %c0_i32 = arith.constant 0 : i32
    %c0_i32_0 = arith.constant 0 : i32
    return %arg0, %c0_i32 : i32, i32
  }
}

</mosaic_0001>

<bundles_post_ra>
// kernel: tpu_custom_call.1
= control target key start
LH: loop header
LB: loop body
LE: loop exit
PB: predicated region body
PF: predicated region fallthrough
CT: control target
= control target key end

     0   :  { %vm79_vm0 = vcmask 261120   ;;  %v419_v2 = vmov 0.0   ;;  %vm420_vm1 = vmmov 0   ;;  %s717_s0 = inlined_call_operand.vmem [shape: f32[8,64,32], index: 0, kind: input, shape index: {}]   ;;  %s718_s1 = inlined_call_operand.vmem [shape: f32[32,128], index: 1, kind: input, shape index: {}]   ;;  %s719_s2 = inlined_call_operand.vmem [shape: f32[1,128], index: 2, kind: input, shape index: {}]   ;;  %s720_s3 = inlined_call_operand.hbm [shape: f32[8,128], index: 3, kind: output, shape index: {}]  }
   0x1   :  { %v259_v0 = vld [vmem:[%s718_s1 + $0x18] sm:$0xff]  ;;  %v258_v1 = vld [vmem:[%s718_s1 + $0x10] sm:$0xff]  ;;  %383 = vmatprep.subr.mxu0 %v419_v2  ;;  %v257_v3 = vld [vmem:[%s718_s1 + $0x8] sm:$0xff]  ;;  %391 = vmatprep.mubr.msk.f32.mxu0 %vm420_vm1, %v419_v2 }
   0x2   :  { %v15_v4 = vld [vmem:[%s717_s0] sm:$0xff]  ;;  %v16_v5 = vld [vmem:[%s717_s0 + $0x8] sm:$0xff]  ;;  %384 = vmatpush3.msra.mxu0 %v259_v0  ;;  %v17_v6 = vld [vmem:[%s717_s0 + $0x10] sm:$0xff] }
   0x3   :  { %v18_v7 = vld [vmem:[%s717_s0 + $0x18] sm:$0xff]  ;;  %v19_v8 = vld [vmem:[%s717_s0 + $0x20] sm:$0xff]  ;;  %v80_v9 = vsel %vm79_vm0, %v15_v4, 0.0  ;;  %v81_v10 = vsel %vm79_vm0, %v16_v5, 0.0  ;;  %385 = vmatprep.subr.mxu0 %v419_v2  ;;  %v20_v12 = vld [vmem:[%s717_s0 + $0x28] sm:$0xff]  ;;  %v83_v16 = vsel %vm79_vm0, %v17_v6, 0.0 }
   0x4   :  { %v256_v11 = vld [vmem:[%s718_s1] sm:$0xff]  ;;  %v21_v13 = vld [vmem:[%s717_s0 + $0x30] sm:$0xff]  ;;  %v22_v14 = vld [vmem:[%s717_s0 + $0x38] sm:$0xff]  ;;  %v82_v15 = vadd.f32 %v81_v10, %v80_v9  ;;  %386 = vmatpush3.msra.mxu0 %v258_v1  ;;  %v85_v20 = vsel %vm79_vm0, %v18_v7, 0.0  ;;  %v87_v21 = vsel %vm79_vm0, %v19_v8, 0.0  ;;  %v89_v32 = vsel %vm79_vm0, %v20_v12, 0.0 }
   0x5   :  { %v23_v17 = vld [vmem:[%s717_s0 + $0x40] sm:$0xff]  ;;  %v24_v18 = vld [vmem:[%s717_s0 + $0x48] sm:$0xff]  ;;  %v25_v19 = vld [vmem:[%s717_s0 + $0x50] sm:$0xff]  ;;  %387 = vmatprep.subr.mxu0 %v419_v2  ;;  %v91_v33 = vsel %vm79_vm0, %v21_v13, 0.0  ;;  %v93_v34 = vsel %vm79_vm0, %v22_v14, 0.0 }
   0x6   :  { %v26_v22 = vld [vmem:[%s717_s0 + $0x58] sm:$0xff]  ;;  %v27_v23 = vld [vmem:[%s717_s0 + $0x60] sm:$0xff]  ;;  %v28_v24 = vld [vmem:[%s717_s0 + $0x68] sm:$0xff]  ;;  %v84_v25 = vadd.f32 %v83_v16, %v82_v15  ;;  %v101_v26 = vsel %vm79_vm0, %v23_v17, 0.0  ;;  %v102_v27 = vsel %vm79_vm0, %v24_v18, 0.0  ;;  %v104_v28 = vsel %vm79_vm0, %v25_v19, 0.0  ;;  %388 = vmatpush3.msra.mxu0 %v257_v3 }
   0x7   :  { %v29_v29 = vld [vmem:[%s717_s0 + $0x70] sm:$0xff]  ;;  %v30_v30 = vld [vmem:[%s717_s0 + $0x78] sm:$0xff]  ;;  %v31_v31 = vld [vmem:[%s717_s0 + $0x80] sm:$0xff]  ;;  %v103_v35 = vadd.f32 %v102_v27, %v101_v26  ;;  %389 = vmatprep.subr.mxu0 %v419_v2  ;;  %v106_v40 = vsel %vm79_vm0, %v26_v22, 0.0  ;;  %v108_v41 = vsel %vm79_vm0, %v27_v23, 0.0  ;;  %v110_v46 = vsel %vm79_vm0, %v28_v24, 0.0 }
   0x8   :  { %v32_v36 = vld [vmem:[%s717_s0 + $0x88] sm:$0xff]  ;;  %v33_v37 = vld [vmem:[%s717_s0 + $0x90] sm:$0xff]  ;;  %v34_v38 = vld [vmem:[%s717_s0 + $0x98] sm:$0xff]  ;;  %v86_v39 = vadd.f32 %v85_v20, %v84_v25  ;;  %v122_v42 = vsel %vm79_vm0, %v31_v31, 0.0  ;;  %390 = vmatpush3.msra.mxu0 %v256_v11  ;;  %v112_v53 = vsel %vm79_vm0, %v29_v29, 0.0  ;;  %v114_v54 = vsel %vm79_vm0, %v30_v30, 0.0 }
   0x9   :  { %v35_v43 = vld [vmem:[%s717_s0 + $0xa0] sm:$0xff]  ;;  %v36_v44 = vld [vmem:[%s717_s0 + $0xa8] sm:$0xff]  ;;  %v105_v45 = vadd.f32 %v104_v28, %v103_v35  ;;  %v123_v47 = vsel %vm79_vm0, %v32_v36, 0.0  ;;  %v125_v48 = vsel %vm79_vm0, %v33_v37, 0.0  ;;  %v37_v49 = vld [vmem:[%s717_s0 + $0xb0] sm:$0xff]  ;;  %v127_v60 = vsel %vm79_vm0, %v34_v38, 0.0 }
   0xa   :  { %v39_v50 = vld [vmem:[%s717_s0 + $0xc0] sm:$0xff]  ;;  %v40_v51 = vld [vmem:[%s717_s0 + $0xc8] sm:$0xff]  ;;  %v88_v52 = vadd.f32 %v87_v21, %v86_v39  ;;  %v124_v55 = vadd.f32 %v123_v47, %v122_v42  ;;  %v38_v56 = vld [vmem:[%s717_s0 + $0xb8] sm:$0xff]  ;;  %v129_v61 = vsel %vm79_vm0, %v35_v43, 0.0  ;;  %v131_v8 = vsel %vm79_vm0, %v36_v44, 0.0 }
   0xb   :  { %v41_v57 = vld [vmem:[%s717_s0 + $0xd0] sm:$0xff]  ;;  %v42_v58 = vld [vmem:[%s717_s0 + $0xd8] sm:$0xff]  ;;  %v107_v59 = vadd.f32 %v106_v40, %v105_v45  ;;  %v143_v62 = vsel %vm79_vm0, %v39_v50, 0.0  ;;  %v43_v63 = vld [vmem:[%s717_s0 + $0xe0] sm:$0xff]  ;;  %v144_v2 = vsel %vm79_vm0, %v40_v51, 0.0  ;;  %v133_v9 = vsel %vm79_vm0, %v37_v49, 0.0 }
   0xc   :  { %v90_v0 = vadd.f32 %v89_v32, %v88_v52  ;;  %v126_v1 = vadd.f32 %v125_v48, %v124_v55  ;;  %v146_v3 = vsel %vm79_vm0, %v41_v57, 0.0  ;;  %v47_v4 = vld [vmem:[%s717_s0 + $0x100] sm:$0xff]  ;;  %v48_v5 = vld [vmem:[%s717_s0 + $0x108] sm:$0xff]  ;;  %v49_v6 = vld [vmem:[%s717_s0 + $0x110] sm:$0xff]  ;;  %v145_v10 = vadd.f32 %v144_v2, %v143_v62 }
   0xd   :  { %v109_v7 = vadd.f32 %v108_v41, %v107_v59  ;;  %v44_v11 = vld [vmem:[%s717_s0 + $0xe8] sm:$0xff]  ;;  %v135_v14 = vsel %vm79_vm0, %v38_v56, 0.0  ;;  %v148_v15 = vsel %vm79_vm0, %v42_v58, 0.0  ;;  %v45_v16 = vld [vmem:[%s717_s0 + $0xf0] sm:$0xff]  ;;  %v50_v17 = vld [vmem:[%s717_s0 + $0x118] sm:$0xff]  ;;  %v150_v20 = vsel %vm79_vm0, %v43_v63, 0.0 }
   0xe   :  { %v92_v12 = vadd.f32 %v91_v33, %v90_v0  ;;  %v128_v13 = vadd.f32 %v127_v60, %v126_v1  ;;  %v147_v19 = vadd.f32 %v146_v3, %v145_v10  ;;  %v164_v21 = vsel %vm79_vm0, %v47_v4, 0.0  ;;  %v46_v22 = vld [vmem:[%s717_s0 + $0xf8] sm:$0xff]  ;;  %v51_v27 = vld [vmem:[%s717_s0 + $0x120] sm:$0xff]  ;;  %v56_v33 = vld [vmem:[%s717_s0 + $0x148] sm:$0xff] }
   0xf   :  { %v111_v18 = vadd.f32 %v110_v46, %v109_v7  ;;  %v165_v25 = vsel %vm79_vm0, %v48_v5, 0.0  ;;  %v167_v26 = vsel %vm79_vm0, %v49_v6, 0.0  ;;  %v55_v28 = vld [vmem:[%s717_s0 + $0x140] sm:$0xff]  ;;  %v152_v31 = vsel %vm79_vm0, %v44_v11, 0.0  ;;  %v52_v38 = vld [vmem:[%s717_s0 + $0x128] sm:$0xff]  ;;  %v57_v39 = vld [vmem:[%s717_s0 + $0x150] sm:$0xff] }
  0x10   :  { %v94_v23 = vadd.f32 %v93_v34, %v92_v12  ;;  %v130_v24 = vadd.f32 %v129_v61, %v128_v13  ;;  %v149_v30 = vadd.f32 %v148_v15, %v147_v19  ;;  %v166_v32 = vadd.f32 %v165_v25, %v164_v21  ;;  %v58_v44 = vld [vmem:[%s717_s0 + $0x158] sm:$0xff]  ;;  %v53_v49 = vld [vmem:[%s717_s0 + $0x130] sm:$0xff]  ;;  %v60_v0 = vld [vmem:[%s717_s0 + $0x168] sm:$0xff] }
  0x11   :  { %v113_v29 = vadd.f32 %v112_v53, %v111_v18  ;;  %v154_v36 = vsel %vm79_vm0, %v45_v16, 0.0  ;;  %v169_v37 = vsel %vm79_vm0, %v50_v17, 0.0  ;;  %v156_v42 = vsel %vm79_vm0, %v46_v22, 0.0  ;;  %v54_v59 = vld [vmem:[%s717_s0 + $0x138] sm:$0xff] }
  0x12   :  { %v95_v34 = vrot.slane %v94_v23, 4  ;;  %v132_v35 = vadd.f32 %v131_v8, %v130_v24  ;;  %v151_v41 = vadd.f32 %v150_v20, %v149_v30  ;;  %v168_v43 = vadd.f32 %v167_v26, %v166_v32 }
  0x13   :  { %v115_v40 = vadd.f32 %v114_v54, %v113_v29  ;;  %v171_v47 = vsel %vm79_vm0, %v51_v27, 0.0  ;;  %v185_v48 = vsel %vm79_vm0, %v55_v28, 0.0  ;;  %v186_v53 = vsel %vm79_vm0, %v56_v33, 0.0  ;;  %v59_v54 = vld [vmem:[%s717_s0 + $0x160] sm:$0xff] }
  0x14   :  { %v96_v45 = vadd.f32 %v95_v34, %v94_v23  ;;  %v134_v46 = vadd.f32 %v133_v9, %v132_v35  ;;  %v153_v51 = vadd.f32 %v152_v31, %v151_v41  ;;  %v170_v52 = vadd.f32 %v169_v37, %v168_v43 }
  0x15   :  { %v116_v50 = vrot.slane %v115_v40, 4  ;;  %v173_v56 = vsel %vm79_vm0, %v52_v38, 0.0  ;;  %v187_v57 = vadd.f32 %v186_v53, %v185_v48  ;;  %v188_v58 = vsel %vm79_vm0, %v57_v39, 0.0 }
  0x16   :  { %v136_v55 = vadd.f32 %v135_v14, %v134_v46  ;;  %v155_v61 = vadd.f32 %v154_v36, %v153_v51  ;;  %v172_v62 = vadd.f32 %v171_v47, %v170_v52  ;;  %v190_v63 = vsel %vm79_vm0, %v58_v44, 0.0 }
  0x17   :  { %v117_v60 = vadd.f32 %v116_v50, %v115_v40  ;;  %v97_v1 = vrot.slane %v96_v45, 2  ;;  %v175_v3 = vsel %vm79_vm0, %v53_v49, 0.0  ;;  %v189_v4 = vadd.f32 %v188_v58, %v187_v57 }
  0x18   :  { %v137_v2 = vrot.slane %v136_v55, 4 }
  0x19   :  { %8 = vsyncpa [#allocation3], 0  ;;  %v61_v5 = vld [vmem:[%s717_s0 + $0x170] sm:$0xff]  ;;  %v63_v6 = vld [vmem:[%s717_s0 + $0x180] sm:$0xff]  ;;  %v157_v7 = vadd.f32 %v156_v42, %v155_v61  ;;  %v174_v8 = vadd.f32 %v173_v56, %v172_v62  ;;  %v192_v9 = vsel %vm79_vm0, %v59_v54, 0.0  ;;  %v118_v11 = vrot.slane %v117_v60, 2 }
  0x1a   :  { %v64_v10 = vld [vmem:[%s717_s0 + $0x188] sm:$0xff]  ;;  %v138_v12 = vadd.f32 %v137_v2, %v136_v55  ;;  %v177_v13 = vsel %vm79_vm0, %v54_v59, 0.0  ;;  %v191_v14 = vadd.f32 %v190_v63, %v189_v4  ;;  %v65_v15 = vld [vmem:[%s717_s0 + $0x190] sm:$0xff]  ;;  %v194_v18 = vsel %vm79_vm0, %v60_v0, 0.0  ;;  %v62_v19 = vld [vmem:[%s717_s0 + $0x178] sm:$0xff]  ;;  %s421_s10 = smov [#allocation2]  }
  0x1b   :  { %v158_v16 = vrot.slane %v157_v7, 4  ;;  %v176_v17 = vadd.f32 %v175_v3, %v174_v8  ;;  %v66_v20 = vld [vmem:[%s717_s0 + $0x198] sm:$0xff]  ;;  %v98_v21 = vadd.f32 %v97_v1, %v96_v45  ;;  %v196_v23 = vsel %vm79_vm0, %v61_v5, 0.0  ;;  %v67_v29 = vld [vmem:[%s717_s0 + $0x1a0] sm:$0xff]  ;;  %v68_v38 = vld [vmem:[%s717_s0 + $0x1a8] sm:$0xff]  ;;  %s368_s1 = sshll.u32 %s421_s10, 4  ;;  %s369_s1 = int_to_ptr.vmem [resolvable:$true] %s368_s1 }
  0x1c   :  { %v193_v22 = vadd.f32 %v192_v9, %v191_v14  ;;  %v206_v24 = vsel %vm79_vm0, %v63_v6, 0.0  ;;  %v139_v25 = vrot.slane %v138_v12, 2  ;;  %v207_v28 = vsel %vm79_vm0, %v64_v10, 0.0  ;;  %v71_v39 = vld [vmem:[%s717_s0 + $0x1c0] sm:$0xff]  ;;  %v72_v40 = vld [vmem:[%s717_s0 + $0x1c8] sm:$0xff]  ;;  %v73_v43 = vld [vmem:[%s717_s0 + $0x1d0] sm:$0xff]  ;;  %p402_p1 = scmp.lt.s32.totalorder %s369_s1, %s369_s1 }
  0x1d   :  { %v159_v26 = vadd.f32 %v158_v16, %v157_v7  ;;  %v178_v27 = vadd.f32 %v177_v13, %v176_v17  ;;  %v119_v30 = vadd.f32 %v118_v11, %v117_v60  ;;  %v208_v32 = vadd.f32 %v207_v28, %v206_v24  ;;  %v69_v48 = vld [vmem:[%s717_s0 + $0x1b0] sm:$0xff]  ;;  %v74_v49 = vld [vmem:[%s717_s0 + $0x1d8] sm:$0xff]  ;;  %v75_v59 = vld [vmem:[%s717_s0 + $0x1e0] sm:$0xff]  ;;  %s397_s11 = scalar_lea.vmem %s369_s1, 128 }
  0x1e   :  { %v195_v31 = vadd.f32 %v194_v18, %v193_v22  ;;  %v209_v33 = vsel %vm79_vm0, %v65_v15, 0.0  ;;  %v198_v36 = vsel %vm79_vm0, %v62_v19, 0.0  ;;  %v211_v37 = vsel %vm79_vm0, %v66_v20, 0.0  ;;  %v70_v58 = vld [vmem:[%s717_s0 + $0x1b8] sm:$0xff]  ;;  %v76_v4 = vld [vmem:[%s717_s0 + $0x1e8] sm:$0xff]  ;;  %p398_p0 = scmp.ne.s32.totalorder %s369_s1, %s397_s11  ;;  %p403_p2 = scmp.lt.s32.totalorder %s397_s11, %s397_s11 }
  0x1f   :  { %v160_v34 = vrot.slane %v159_v26, 2  ;;  %v179_v35 = vrot.slane %v178_v27, 4  ;;  %v210_v42 = vadd.f32 %v209_v33, %v208_v32  ;;  %v99_v44 = vrot.slane %v98_v21, 1  ;;  %v78_v20 = vld [vmem:[%s717_s0 + $0x1f8] sm:$0xff] }
  0x20   :  { %v197_v41 = vadd.f32 %v196_v23, %v195_v31  ;;  %v140_v45 = vadd.f32 %v139_v25, %v138_v12  ;;  %v213_v47 = vsel %vm79_vm0, %v67_v29, 0.0  ;;  %v120_v50 = vrot.slane %v119_v30, 1  ;;  %v77_v12 = vld [vmem:[%s717_s0 + $0x1f0] sm:$0xff]  ;;  %p404_p3 = por %p403_p2, %p402_p1 }
  0x21   :  { %v180_v46 = vadd.f32 %v179_v35, %v178_v27  ;;  %v161_v51 = vadd.f32 %v160_v34, %v159_v26  ;;  %v212_v53 = vadd.f32 %v211_v37, %v210_v42  ;;  %v215_v55 = vsel %vm79_vm0, %v68_v38, 0.0 }
  0x22   :  { %v199_v52 = vadd.f32 %v198_v36, %v197_v41  ;;  %v227_v56 = vsel %vm79_vm0, %v71_v39, 0.0  ;;  %v228_v57 = vsel %vm79_vm0, %v72_v40, 0.0  ;;  %v230_v63 = vsel %vm79_vm0, %v73_v43, 0.0  ;;  %p405_p4 = pnand %p404_p3, %p398_p0 }
  0x23   :  { %v181_v54 = vrot.slane %v180_v46, 2  ;;  %v214_v61 = vadd.f32 %v213_v47, %v212_v53  ;;  %v229_v62 = vadd.f32 %v228_v57, %v227_v56  ;;  %v100_v0 = vadd.f32 %v99_v44, %v98_v21 }
  0x24   :  { %v200_v60 = vrot.slane %v199_v52, 4  ;;  %v141_v1 = vrot.slane %v140_v45, 1  ;;  %v217_v2 = vsel %vm79_vm0, %v69_v48, 0.0  ;;  %v232_v3 = vsel %vm79_vm0, %v74_v49, 0.0 }
  0x25   :  { %v121_v5 = vadd.f32 %v120_v50, %v119_v30  ;;  %v216_v7 = vadd.f32 %v215_v55, %v214_v61  ;;  %v231_v8 = vadd.f32 %v230_v63, %v229_v62  ;;  %v182_v9 = vadd.f32 %v181_v54, %v180_v46 }
  0x26   :  { %v201_v6 = vadd.f32 %v200_v60, %v199_v52  ;;  %v219_v10 = vsel %vm79_vm0, %v70_v58, 0.0  ;;  %v234_v11 = vsel %vm79_vm0, %v75_v59, 0.0  ;;  %v162_v13 = vrot.slane %v161_v51, 1  ;;  %v376_v60 = vld [vmem:[%s719_s2] ss:$0 sm:$0xff] }
  0x27   :  { %v218_v15 = vadd.f32 %v217_v2, %v216_v7  ;;  %v233_v16 = vadd.f32 %v232_v3, %v231_v8  ;;  %v142_v17 = vadd.f32 %v141_v1, %v140_v45  ;;  %v236_v18 = vsel %vm79_vm0, %v76_v4, 0.0 }
  0x28   :  { %v202_v14 = vrot.slane %v201_v6, 2  ;;  %v248_v19 = vmul.f32 0.015625, %v100_v0  ;;  %v249_v24 = vmul.f32 0.015625, %v121_v5  ;;  %v183_v25 = vrot.slane %v182_v9, 1 }
  0x29   :  { %v220_v22 = vadd.f32 %v219_v10, %v218_v15  ;;  %v235_v23 = vadd.f32 %v234_v11, %v233_v16  ;;  %v238_v26 = vsel %vm79_vm0, %v77_v12, 0.0  ;;  %vm275_vm2 = vcmask 1041409  }
  0x2a   :  { %v203_v21 = vadd.f32 %v202_v14, %v201_v6  ;;  %v163_v27 = vadd.f32 %v162_v13, %v161_v51  ;;  %v240_v30 = vsel %vm79_vm0, %v78_v20, 0.0  ;;  %v250_v31 = vmul.f32 0.015625, %v142_v17 }
  0x2b   :  { %v221_v28 = vrot.slane %v220_v22, 4  ;;  %v237_v29 = vadd.f32 %v236_v18, %v235_v23  ;;  %vm277_vm3 = vcmask 1042434   ;;  %v276_v35 = vsel %vm275_vm2, %v249_v24, %v248_v19 }
  0x2c   :  { %v204_v32 = vrot.slane %v203_v21, 1  ;;  %v184_v36 = vadd.f32 %v183_v25, %v182_v9  ;;  %v251_v39 = vmul.f32 0.015625, %v163_v27  ;;  %v278_v40 = vsel %vm277_vm3, %v250_v31, %v276_v35 }
  0x2d   :  { %v222_v33 = vadd.f32 %v221_v28, %v220_v22  ;;  %v239_v34 = vadd.f32 %v238_v26, %v237_v29  ;;  %vm279_vm4 = vcmask 1043459   ;;  %vm281_vm5 = vcmask 1044484  }
  0x2e   :  { %v205_v41 = vadd.f32 %v204_v32, %v203_v21  ;;  %v252_v44 = vmul.f32 0.015625, %v184_v36  ;;  %v280_v47 = vsel %vm279_vm4, %v251_v39, %v278_v40  ;;  %vm283_vm6 = vcmask 1045509  }
  0x2f   :  { %v223_v37 = vrot.slane %v222_v33, 2  ;;  %v241_v38 = vadd.f32 %v240_v30, %v239_v34  ;;  %vm285_vm7 = vcmask 1046534   ;;  %vm287_vm8 = vcmask 1047559  }
  0x30   :  { %v253_v50 = vmul.f32 0.015625, %v205_v41  ;;  %v282_v51 = vsel %vm281_vm5, %v252_v44, %v280_v47 }
  0x31   :  { %v224_v42 = vadd.f32 %v223_v37, %v222_v33  ;;  %v242_v43 = vrot.slane %v241_v38, 4 }
  0x32   :  { %v284_v55 = vsel %vm283_vm6, %v253_v50, %v282_v51 }
  0x33   :  { %v225_v45 = vrot.slane %v224_v42, 1  ;;  %v243_v46 = vadd.f32 %v242_v43, %v241_v38 }
  0x35   :  { %v226_v48 = vadd.f32 %v225_v45, %v224_v42  ;;  %v244_v49 = vrot.slane %v243_v46, 2 }
  0x37   :  { %v245_v52 = vadd.f32 %v244_v49, %v243_v46  ;;  %v254_v53 = vmul.f32 0.015625, %v226_v48 }
  0x39   :  { %v246_v54 = vrot.slane %v245_v52, 1  ;;  %v286_v57 = vsel %vm285_vm7, %v254_v53, %v284_v55 }
  0x3b   :  { %v247_v56 = vadd.f32 %v246_v54, %v245_v52 }
  0x3d   :  { %v255_v58 = vmul.f32 0.015625, %v247_v56 }
  0x3f   :  { %v288_v59 = vsel %vm287_vm8, %v255_v58, %v286_v57 }
  0x40   :  { %392 = vmatmul.mubr.msk.f32.vlgmr.msra.gmra.mxu0 %vm79_vm0, %v288_v59 }
 0x100   :  { %v357_v61 = vpop.f32.mrf.mxu0 }
 0x101   :  { %v358_v62 = vadd.f32 %v376_v60, %v357_v61 }
 0x102   :  { %v393_v63 = vpop.f32.mrf.mxu0 }
 0x103   :  { %361 = vst [vmem:[#allocation2] sm:$0xff] %v358_v62 }
 0x104   :  { %408 = shalt.err (!%p405_p4)
}
 0x105   :  { %371 = dma.vmem_to_hbm [thread:$0]  %s369_s1, 128, %s720_s3, [#allocation3]  }
 0x106   :  { %417 = dma.done.wait [#allocation3], 128  }
 0x107   :  { %418 = vsyncadd [#allocation3], 4294967168 }
 0x108   :  { %375 = vsyncpa [#allocation3], 1 }

</bundles_post_ra>
